<compile_context>
chip_gen: v7x
topology: tpu7x:2x2x1
jax: 0.10.0
libtpu: 0.0.40
codegen_flags: <defaults>
</compile_context>

<pallas_src>
import jax
import jax.numpy as jnp
from jax.experimental import pallas as pl
from jax.experimental.pallas import tpu as pltpu


# ----------------------------- Pallas kernel --------------------------------

_N_MID = 8  # units 2..9, all presented as (128 -> 128) after zero-padding


def _fused_mlp_kernel(x_ref, w1_ref, b1_ref, wmid_ref, bmid_ref,
                      wout_ref, bout_ref, o_ref):
    """Fully fused forward pass for one batch tile.

      x_ref    : (tb, 640)      f32   VMEM
      w1_ref   : (640, 128)     bf16  VMEM  (BN scale folded in)
      b1_ref   : (1, 128)       f32   VMEM  (Linear bias*scale + BN shift)
      wmid_ref : (8, 128, 128)  bf16  VMEM  (units 2..9, zero-padded)
      bmid_ref : (8, 1, 128)    f32   VMEM
      wout_ref : (128, 640)     bf16  VMEM  (plain Linear, no BN/ReLU)
      bout_ref : (1, 640)       f32   VMEM
      o_ref    : (tb, 640)      f32   VMEM
    """
    h = x_ref[...].astype(jnp.float32)

    # unit1: 640 -> 128, folded BN, ReLU.
    h = jnp.dot(h.astype(jnp.bfloat16), w1_ref[...],
                preferred_element_type=jnp.float32) + b1_ref[...]
    h = jnp.maximum(h, 0.0)

    # units 2..9: statically unrolled, all 128 -> 128 after padding.
    for i in range(_N_MID):
        w = wmid_ref[i]                                  # (128, 128) bf16
        b = bmid_ref[i]                                  # (1, 128)   f32
        h = jnp.dot(h.astype(jnp.bfloat16), w,
                    preferred_element_type=jnp.float32) + b
        h = jnp.maximum(h, 0.0)

    # output: plain Linear 128 -> 640 (no BN, no ReLU).
    h = jnp.dot(h.astype(jnp.bfloat16), wout_ref[...],
                preferred_element_type=jnp.float32) + bout_ref[...]
    o_ref[...] = h.astype(o_ref.dtype)


def fused_forward(x2d, packed_params):
    """Run the entire network as a single Pallas call with a batch grid."""
    w1, b1, wmid, bmid, wout, bout = packed_params
    B, in_dim = x2d.shape
    out_dim = wout.shape[1]

    # Batch tile: 256 rows per grid step for large batches (amortizes launch /
    # weight residency, feeds MXU rows); otherwise the whole (sublane-padded)
    # batch in one block.
    if B >= 256:
        tb = 256
    else:
        tb = max(8, -(-B // 8) * 8)
    Bp = -(-B // tb) * tb
    if Bp != B:
        x2d = jnp.pad(x2d, ((0, Bp - B), (0, 0)))
    grid = (Bp // tb,)

    def resident(shape):
        # Full-array block, same block every grid step -> stays in VMEM.
        return pl.BlockSpec(shape, lambda i: (0,) * len(shape))

    in_specs = [
        pl.BlockSpec((tb, in_dim), lambda i: (i, 0)),    # activations tile
        resident(w1.shape), resident(b1.shape),
        resident(wmid.shape), resident(bmid.shape),
        resident(wout.shape), resident(bout.shape),
    ]
    out_specs = pl.BlockSpec((tb, out_dim), lambda i: (i, 0))

    flops = 2 * Bp * sum(din * dout for din, dout in _LAYER_DIMS)
    param_bytes = sum(int(p.size) * p.dtype.itemsize for p in packed_params)
    bytes_accessed = param_bytes + int(x2d.size) * 4 + Bp * out_dim * 4

    out = pl.pallas_call(
        _fused_mlp_kernel,
        out_shape=jax.ShapeDtypeStruct((Bp, out_dim), jnp.float32),
        grid=grid,
        in_specs=in_specs,
        out_specs=out_specs,
        compiler_params=pltpu.CompilerParams(
            dimension_semantics=("parallel",)),
        cost_estimate=pl.CostEstimate(
            flops=flops, transcendentals=0, bytes_accessed=bytes_accessed),
    )(x2d, w1, b1, wmid, bmid, wout, bout)
    return out[:B]


# --------------------------- Parameter creation ------------------------------

_LAYER_DIMS = [
    (640, 128),  # unit1
    (128, 128),  # unit2
    (128, 128),  # unit3
    (128, 128),  # unit4
    (128, 8),    # unit5
    (8, 128),    # unit6
    (128, 128),  # unit7
    (128, 128),  # unit8
    (128, 128),  # unit9
    (128, 640),  # output (plain Linear, no BN, no ReLU)
]

_BN_EPS = 1e-5


def init_params(key):
    """Synthetic parameters matching the PyTorch module's shapes.

    Returns:
      raw     : per-layer (w, b, gamma, beta, mean, var, has_bn) for the
                pure-JAX reference (unfolded, eval-mode BN semantics).
      folded  : per-layer (w_folded, b_folded) in f32 (BN folded into Linear).
      packed  : (w1, b1, wmid, bmid, wout, bout) tensors fed to the kernel;
                weights in bf16, biases in f32, middle layers stacked/padded.
    """
    raw, folded = [], []
    n_layers = len(_LAYER_DIMS)
    for i, (din, dout) in enumerate(_LAYER_DIMS):
        key, kw, kb, kg, kbe, km, kv = jax.random.split(key, 7)
        bound = 1.0 / jnp.sqrt(jnp.float32(din))
        # PyTorch Linear default init (uniform), stored transposed as (in, out).
        w = jax.random.uniform(kw, (din, dout), jnp.float32, -bound, bound)
        b = jax.random.uniform(kb, (dout,), jnp.float32, -bound, bound)
        has_bn = i < n_layers - 1
        if has_bn:
            gamma = jax.random.uniform(kg, (dout,), jnp.float32, 0.5, 1.5)
            beta = jax.random.uniform(kbe, (dout,), jnp.float32, -0.1, 0.1)
            mean = jax.random.uniform(km, (dout,), jnp.float32, -0.1, 0.1)
            var = jax.random.uniform(kv, (dout,), jnp.float32, 0.8, 1.2)
            inv_std = 1.0 / jnp.sqrt(var + _BN_EPS)
            scale = gamma * inv_std                      # (dout,)
            shift = beta - mean * scale                  # (dout,)
            w_f = w * scale[None, :]
            b_f = b * scale + shift
        else:
            gamma = beta = mean = var = None
            w_f, b_f = w, b
        raw.append((w, b, gamma, beta, mean, var, has_bn))
        folded.append((w_f, b_f))

    # --- Pack for the kernel ---
    w1 = folded[0][0].astype(jnp.bfloat16)               # (640, 128)
    b1 = folded[0][1].reshape(1, -1)                     # (1, 128) f32

    wmid_list, bmid_list = [], []
    for i in range(1, 9):                                # units 2..9
        w_f, b_f = folded[i]
        din, dout = w_f.shape
        # Zero-pad to (128, 128) / (128,).  Padded output columns produce
        # relu(0) = 0; padded input rows multiply those zeros -> identity.
        w_pad = jnp.zeros((128, 128), jnp.float32).at[:din, :dout].set(w_f)
        b_pad = jnp.zeros((128,), jnp.float32).at[:dout].set(b_f)
        wmid_list.append(w_pad)
        bmid_list.append(b_pad.reshape(1, 128))
    wmid = jnp.stack(wmid_list).astype(jnp.bfloat16)     # (8, 128, 128)
    bmid = jnp.stack(bmid_list)                          # (8, 1, 128) f32

    wout = folded[9][0].astype(jnp.bfloat16)             # (128, 640)
    bout = folded[9][1].reshape(1, -1)                   # (1, 640) f32

    packed = (w1, b1, wmid, bmid, wout, bout)
    return raw, folded, packed


# ------------------------------ Forward pass ---------------------------------

def task2_baseline_forward(x, packed_params):
    orig_shape = x.shape
    h = x.reshape(x.shape[0], -1)                        # x.view(x.size(0), -1)
    out = fused_forward(h, packed_params)
    return out.reshape(orig_shape)


def reference_f32(x, raw):
    """Pure-JAX f32 reference with explicit (un-folded) eval-mode BatchNorm."""
    h = x.reshape(x.shape[0], -1)
    for (w, b, gamma, beta, mean, var, has_bn) in raw:
        h = jnp.dot(h, w, precision=jax.lax.Precision.HIGHEST) + b
        if has_bn:
            h = (h - mean) / jnp.sqrt(var + _BN_EPS) * gamma + beta
            h = jnp.maximum(h, 0.0)
    return h.reshape(x.shape)


def reference_folded_bf16(x, folded):
    """Reference using the same bf16-quantized folded weights (f32 math)."""
    h = x.reshape(x.shape[0], -1).astype(jnp.float32)
    n = len(folded)
    for i, (w_f, b_f) in enumerate(folded):
        w_q = w_f.astype(jnp.bfloat16).astype(jnp.float32)
        h_q = h.astype(jnp.bfloat16).astype(jnp.float32)
        h = jnp.dot(h_q, w_q, precision=jax.lax.Precision.HIGHEST) + b_f
        if i < n - 1:
            h = jnp.maximum(h, 0.0)
    return h.reshape(x.shape)


# ----------------------------------- Main ------------------------------------

if __name__ == "__main__":
    key = jax.random.PRNGKey(0)
    key, kx = jax.random.split(key)
    # Input: (B, 5, 128) flattens to (B, 640) as required by unit1.
    x = jax.random.normal(kx, (8, 5, 128), jnp.float32)

    raw_params, folded_params, packed_params = init_params(key)

    out = task2_baseline_forward(x, packed_params)
    out = jax.block_until_ready(out)
    assert out.shape == x.shape

    # Tight check: same bf16-quantized weights, pure-JAX math.
    ref_q = reference_folded_bf16(x, folded_params)
    assert jnp.allclose(out, ref_q, atol=1e-3, rtol=1e-3), \
        "mismatch vs bf16-folded JAX reference"

    # Looser check: full-precision f32 reference with explicit BN
    # (difference is the bf16 weight quantization, compounded over 10 layers).
    ref_f = reference_f32(x, raw_params)
    assert jnp.allclose(out, ref_f, atol=5e-2, rtol=5e-2), \
        "mismatch vs f32 un-folded reference"

    print("KERNEL_OK")
</pallas_src>

<mosaic_0001>
module attributes {stable_mosaic.version = 11 : i64} {
  func.func @_fused_mlp_kernel(%arg0: i32, %arg1: memref<8x640xf32, #tpu.memory_space<vmem>>, %arg2: memref<640x128xbf16, #tpu.memory_space<vmem>>, %arg3: memref<1x128xf32, #tpu.memory_space<vmem>>, %arg4: memref<8x128x128xbf16, #tpu.memory_space<vmem>>, %arg5: memref<8x1x128xf32, #tpu.memory_space<vmem>>, %arg6: memref<128x640xbf16, #tpu.memory_space<vmem>>, %arg7: memref<1x640xf32, #tpu.memory_space<vmem>>, %arg8: memref<8x640xf32, #tpu.memory_space<vmem>>) attributes {dimension_semantics = [#tpu.dimension_semantics<parallel>], iteration_bounds = array<i64: 1>, scalar_prefetch = 0 : i64, scratch_operands = 0 : i64, tpu.core_type = #tpu.core_type<tc>, window_params = [{transform_indices = @transform_0, window_bounds = array<i64: 8, 640>}, {pipeline_mode = #tpu.pipeline_mode<synchronous>, transform_indices = @transform_1, window_bounds = array<i64: 640, 128>}, {pipeline_mode = #tpu.pipeline_mode<synchronous>, transform_indices = @transform_2, window_bounds = array<i64: 1, 128>}, {pipeline_mode = #tpu.pipeline_mode<synchronous>, transform_indices = @transform_3, window_bounds = array<i64: 8, 128, 128>}, {pipeline_mode = #tpu.pipeline_mode<synchronous>, transform_indices = @transform_4, window_bounds = array<i64: 8, 1, 128>}, {pipeline_mode = #tpu.pipeline_mode<synchronous>, transform_indices = @transform_5, window_bounds = array<i64: 128, 640>}, {pipeline_mode = #tpu.pipeline_mode<synchronous>, transform_indices = @transform_6, window_bounds = array<i64: 1, 640>}, {transform_indices = @transform_7, window_bounds = array<i64: 8, 640>}]} {
    %c0 = arith.constant 0 : index
    %c0_0 = arith.constant 0 : index
    %0 = vector.load %arg1[%c0, %c0_0] : memref<8x640xf32, #tpu.memory_space<vmem>>, vector<8x640xf32>
    %1 = arith.truncf %0 : vector<8x640xf32> to vector<8x640xbf16>
    %c0_1 = arith.constant 0 : index
    %c0_2 = arith.constant 0 : index
    %2 = vector.load %arg2[%c0_1, %c0_2] : memref<640x128xbf16, #tpu.memory_space<vmem>>, vector<640x128xbf16>
    %cst = arith.constant dense<0.000000e+00> : vector<8x128xf32>
    %3 = tpu.matmul %1, %2, %cst {dimension_numbers = #tpu.dot_dimension_numbers<[1], [0], [0], [1], [0, 0, 1, 1], [], []>} : vector<8x640xbf16>, vector<640x128xbf16>, vector<8x128xf32> -> vector<8x128xf32>
    %c0_3 = arith.constant 0 : index
    %c0_4 = arith.constant 0 : index
    %4 = vector.load %arg3[%c0_3, %c0_4] : memref<1x128xf32, #tpu.memory_space<vmem>>, vector<1x128xf32>
    %5 = vector.broadcast %4 : vector<1x128xf32> to vector<8x128xf32>
    %6 = arith.addf %3, %5 : vector<8x128xf32>
    %cst_5 = arith.constant 0.000000e+00 : f32
    %7 = vector.broadcast %cst_5 : f32 to vector<8x128xf32>
    %8 = arith.maximumf %6, %7 : vector<8x128xf32>
    %c0_6 = arith.constant 0 : index
    %c0_7 = arith.constant 0 : index
    %c0_8 = arith.constant 0 : index
    %9 = vector.load %arg4[%c0_6, %c0_7, %c0_8] : memref<8x128x128xbf16, #tpu.memory_space<vmem>>, vector<1x128x128xbf16>
    %10 = vector.shape_cast %9 : vector<1x128x128xbf16> to vector<128x128xbf16>
    %c0_9 = arith.constant 0 : index
    %c0_10 = arith.constant 0 : index
    %c0_11 = arith.constant 0 : index
    %11 = vector.load %arg5[%c0_9, %c0_10, %c0_11] : memref<8x1x128xf32, #tpu.memory_space<vmem>>, vector<1x1x128xf32>
    %12 = vector.shape_cast %11 : vector<1x1x128xf32> to vector<1x128xf32>
    %13 = arith.truncf %8 : vector<8x128xf32> to vector<8x128xbf16>
    %cst_12 = arith.constant dense<0.000000e+00> : vector<8x128xf32>
    %14 = tpu.matmul %13, %10, %cst_12 {dimension_numbers = #tpu.dot_dimension_numbers<[1], [0], [0], [1], [0, 0, 1, 1], [], []>} : vector<8x128xbf16>, vector<128x128xbf16>, vector<8x128xf32> -> vector<8x128xf32>
    %15 = vector.broadcast %12 : vector<1x128xf32> to vector<8x128xf32>
    %16 = arith.addf %14, %15 : vector<8x128xf32>
    %cst_13 = arith.constant 0.000000e+00 : f32
    %17 = vector.broadcast %cst_13 : f32 to vector<8x128xf32>
    %18 = arith.maximumf %16, %17 : vector<8x128xf32>
    %c1 = arith.constant 1 : index
    %c0_14 = arith.constant 0 : index
    %c0_15 = arith.constant 0 : index
    %19 = vector.load %arg4[%c1, %c0_14, %c0_15] : memref<8x128x128xbf16, #tpu.memory_space<vmem>>, vector<1x128x128xbf16>
    %20 = vector.shape_cast %19 : vector<1x128x128xbf16> to vector<128x128xbf16>
    %c1_16 = arith.constant 1 : index
    %c0_17 = arith.constant 0 : index
    %c0_18 = arith.constant 0 : index
    %21 = vector.load %arg5[%c1_16, %c0_17, %c0_18] : memref<8x1x128xf32, #tpu.memory_space<vmem>>, vector<1x1x128xf32>
    %22 = vector.shape_cast %21 : vector<1x1x128xf32> to vector<1x128xf32>
    %23 = arith.truncf %18 : vector<8x128xf32> to vector<8x128xbf16>
    %cst_19 = arith.constant dense<0.000000e+00> : vector<8x128xf32>
    %24 = tpu.matmul %23, %20, %cst_19 {dimension_numbers = #tpu.dot_dimension_numbers<[1], [0], [0], [1], [0, 0, 1, 1], [], []>} : vector<8x128xbf16>, vector<128x128xbf16>, vector<8x128xf32> -> vector<8x128xf32>
    %25 = vector.broadcast %22 : vector<1x128xf32> to vector<8x128xf32>
    %26 = arith.addf %24, %25 : vector<8x128xf32>
    %cst_20 = arith.constant 0.000000e+00 : f32
    %27 = vector.broadcast %cst_20 : f32 to vector<8x128xf32>
    %28 = arith.maximumf %26, %27 : vector<8x128xf32>
    %c2 = arith.constant 2 : index
    %c0_21 = arith.constant 0 : index
    %c0_22 = arith.constant 0 : index
    %29 = vector.load %arg4[%c2, %c0_21, %c0_22] : memref<8x128x128xbf16, #tpu.memory_space<vmem>>, vector<1x128x128xbf16>
    %30 = vector.shape_cast %29 : vector<1x128x128xbf16> to vector<128x128xbf16>
    %c2_23 = arith.constant 2 : index
    %c0_24 = arith.constant 0 : index
    %c0_25 = arith.constant 0 : index
    %31 = vector.load %arg5[%c2_23, %c0_24, %c0_25] : memref<8x1x128xf32, #tpu.memory_space<vmem>>, vector<1x1x128xf32>
    %32 = vector.shape_cast %31 : vector<1x1x128xf32> to vector<1x128xf32>
    %33 = arith.truncf %28 : vector<8x128xf32> to vector<8x128xbf16>
    %cst_26 = arith.constant dense<0.000000e+00> : vector<8x128xf32>
    %34 = tpu.matmul %33, %30, %cst_26 {dimension_numbers = #tpu.dot_dimension_numbers<[1], [0], [0], [1], [0, 0, 1, 1], [], []>} : vector<8x128xbf16>, vector<128x128xbf16>, vector<8x128xf32> -> vector<8x128xf32>
    %35 = vector.broadcast %32 : vector<1x128xf32> to vector<8x128xf32>
    %36 = arith.addf %34, %35 : vector<8x128xf32>
    %cst_27 = arith.constant 0.000000e+00 : f32
    %37 = vector.broadcast %cst_27 : f32 to vector<8x128xf32>
    %38 = arith.maximumf %36, %37 : vector<8x128xf32>
    %c3 = arith.constant 3 : index
    %c0_28 = arith.constant 0 : index
    %c0_29 = arith.constant 0 : index
    %39 = vector.load %arg4[%c3, %c0_28, %c0_29] : memref<8x128x128xbf16, #tpu.memory_space<vmem>>, vector<1x128x128xbf16>
    %40 = vector.shape_cast %39 : vector<1x128x128xbf16> to vector<128x128xbf16>
    %c3_30 = arith.constant 3 : index
    %c0_31 = arith.constant 0 : index
    %c0_32 = arith.constant 0 : index
    %41 = vector.load %arg5[%c3_30, %c0_31, %c0_32] : memref<8x1x128xf32, #tpu.memory_space<vmem>>, vector<1x1x128xf32>
    %42 = vector.shape_cast %41 : vector<1x1x128xf32> to vector<1x128xf32>
    %43 = arith.truncf %38 : vector<8x128xf32> to vector<8x128xbf16>
    %cst_33 = arith.constant dense<0.000000e+00> : vector<8x128xf32>
    %44 = tpu.matmul %43, %40, %cst_33 {dimension_numbers = #tpu.dot_dimension_numbers<[1], [0], [0], [1], [0, 0, 1, 1], [], []>} : vector<8x128xbf16>, vector<128x128xbf16>, vector<8x128xf32> -> vector<8x128xf32>
    %45 = vector.broadcast %42 : vector<1x128xf32> to vector<8x128xf32>
    %46 = arith.addf %44, %45 : vector<8x128xf32>
    %cst_34 = arith.constant 0.000000e+00 : f32
    %47 = vector.broadcast %cst_34 : f32 to vector<8x128xf32>
    %48 = arith.maximumf %46, %47 : vector<8x128xf32>
    %c4 = arith.constant 4 : index
    %c0_35 = arith.constant 0 : index
    %c0_36 = arith.constant 0 : index
    %49 = vector.load %arg4[%c4, %c0_35, %c0_36] : memref<8x128x128xbf16, #tpu.memory_space<vmem>>, vector<1x128x128xbf16>
    %50 = vector.shape_cast %49 : vector<1x128x128xbf16> to vector<128x128xbf16>
    %c4_37 = arith.constant 4 : index
    %c0_38 = arith.constant 0 : index
    %c0_39 = arith.constant 0 : index
    %51 = vector.load %arg5[%c4_37, %c0_38, %c0_39] : memref<8x1x128xf32, #tpu.memory_space<vmem>>, vector<1x1x128xf32>
    %52 = vector.shape_cast %51 : vector<1x1x128xf32> to vector<1x128xf32>
    %53 = arith.truncf %48 : vector<8x128xf32> to vector<8x128xbf16>
    %cst_40 = arith.constant dense<0.000000e+00> : vector<8x128xf32>
    %54 = tpu.matmul %53, %50, %cst_40 {dimension_numbers = #tpu.dot_dimension_numbers<[1], [0], [0], [1], [0, 0, 1, 1], [], []>} : vector<8x128xbf16>, vector<128x128xbf16>, vector<8x128xf32> -> vector<8x128xf32>
    %55 = vector.broadcast %52 : vector<1x128xf32> to vector<8x128xf32>
    %56 = arith.addf %54, %55 : vector<8x128xf32>
    %cst_41 = arith.constant 0.000000e+00 : f32
    %57 = vector.broadcast %cst_41 : f32 to vector<8x128xf32>
    %58 = arith.maximumf %56, %57 : vector<8x128xf32>
    %c5 = arith.constant 5 : index
    %c0_42 = arith.constant 0 : index
    %c0_43 = arith.constant 0 : index
    %59 = vector.load %arg4[%c5, %c0_42, %c0_43] : memref<8x128x128xbf16, #tpu.memory_space<vmem>>, vector<1x128x128xbf16>
    %60 = vector.shape_cast %59 : vector<1x128x128xbf16> to vector<128x128xbf16>
    %c5_44 = arith.constant 5 : index
    %c0_45 = arith.constant 0 : index
    %c0_46 = arith.constant 0 : index
    %61 = vector.load %arg5[%c5_44, %c0_45, %c0_46] : memref<8x1x128xf32, #tpu.memory_space<vmem>>, vector<1x1x128xf32>
    %62 = vector.shape_cast %61 : vector<1x1x128xf32> to vector<1x128xf32>
    %63 = arith.truncf %58 : vector<8x128xf32> to vector<8x128xbf16>
    %cst_47 = arith.constant dense<0.000000e+00> : vector<8x128xf32>
    %64 = tpu.matmul %63, %60, %cst_47 {dimension_numbers = #tpu.dot_dimension_numbers<[1], [0], [0], [1], [0, 0, 1, 1], [], []>} : vector<8x128xbf16>, vector<128x128xbf16>, vector<8x128xf32> -> vector<8x128xf32>
    %65 = vector.broadcast %62 : vector<1x128xf32> to vector<8x128xf32>
    %66 = arith.addf %64, %65 : vector<8x128xf32>
    %cst_48 = arith.constant 0.000000e+00 : f32
    %67 = vector.broadcast %cst_48 : f32 to vector<8x128xf32>
    %68 = arith.maximumf %66, %67 : vector<8x128xf32>
    %c6 = arith.constant 6 : index
    %c0_49 = arith.constant 0 : index
    %c0_50 = arith.constant 0 : index
    %69 = vector.load %arg4[%c6, %c0_49, %c0_50] : memref<8x128x128xbf16, #tpu.memory_space<vmem>>, vector<1x128x128xbf16>
    %70 = vector.shape_cast %69 : vector<1x128x128xbf16> to vector<128x128xbf16>
    %c6_51 = arith.constant 6 : index
    %c0_52 = arith.constant 0 : index
    %c0_53 = arith.constant 0 : index
    %71 = vector.load %arg5[%c6_51, %c0_52, %c0_53] : memref<8x1x128xf32, #tpu.memory_space<vmem>>, vector<1x1x128xf32>
    %72 = vector.shape_cast %71 : vector<1x1x128xf32> to vector<1x128xf32>
    %73 = arith.truncf %68 : vector<8x128xf32> to vector<8x128xbf16>
    %cst_54 = arith.constant dense<0.000000e+00> : vector<8x128xf32>
    %74 = tpu.matmul %73, %70, %cst_54 {dimension_numbers = #tpu.dot_dimension_numbers<[1], [0], [0], [1], [0, 0, 1, 1], [], []>} : vector<8x128xbf16>, vector<128x128xbf16>, vector<8x128xf32> -> vector<8x128xf32>
    %75 = vector.broadcast %72 : vector<1x128xf32> to vector<8x128xf32>
    %76 = arith.addf %74, %75 : vector<8x128xf32>
    %cst_55 = arith.constant 0.000000e+00 : f32
    %77 = vector.broadcast %cst_55 : f32 to vector<8x128xf32>
    %78 = arith.maximumf %76, %77 : vector<8x128xf32>
    %c7 = arith.constant 7 : index
    %c0_56 = arith.constant 0 : index
    %c0_57 = arith.constant 0 : index
    %79 = vector.load %arg4[%c7, %c0_56, %c0_57] : memref<8x128x128xbf16, #tpu.memory_space<vmem>>, vector<1x128x128xbf16>
    %80 = vector.shape_cast %79 : vector<1x128x128xbf16> to vector<128x128xbf16>
    %c7_58 = arith.constant 7 : index
    %c0_59 = arith.constant 0 : index
    %c0_60 = arith.constant 0 : index
    %81 = vector.load %arg5[%c7_58, %c0_59, %c0_60] : memref<8x1x128xf32, #tpu.memory_space<vmem>>, vector<1x1x128xf32>
    %82 = vector.shape_cast %81 : vector<1x1x128xf32> to vector<1x128xf32>
    %83 = arith.truncf %78 : vector<8x128xf32> to vector<8x128xbf16>
    %cst_61 = arith.constant dense<0.000000e+00> : vector<8x128xf32>
    %84 = tpu.matmul %83, %80, %cst_61 {dimension_numbers = #tpu.dot_dimension_numbers<[1], [0], [0], [1], [0, 0, 1, 1], [], []>} : vector<8x128xbf16>, vector<128x128xbf16>, vector<8x128xf32> -> vector<8x128xf32>
    %85 = vector.broadcast %82 : vector<1x128xf32> to vector<8x128xf32>
    %86 = arith.addf %84, %85 : vector<8x128xf32>
    %cst_62 = arith.constant 0.000000e+00 : f32
    %87 = vector.broadcast %cst_62 : f32 to vector<8x128xf32>
    %88 = arith.maximumf %86, %87 : vector<8x128xf32>
    %89 = arith.truncf %88 : vector<8x128xf32> to vector<8x128xbf16>
    %c0_63 = arith.constant 0 : index
    %c0_64 = arith.constant 0 : index
    %90 = vector.load %arg6[%c0_63, %c0_64] : memref<128x640xbf16, #tpu.memory_space<vmem>>, vector<128x640xbf16>
    %cst_65 = arith.constant dense<0.000000e+00> : vector<8x640xf32>
    %91 = tpu.matmul %89, %90, %cst_65 {dimension_numbers = #tpu.dot_dimension_numbers<[1], [0], [0], [1], [0, 0, 1, 1], [], []>} : vector<8x128xbf16>, vector<128x640xbf16>, vector<8x640xf32> -> vector<8x640xf32>
    %c0_66 = arith.constant 0 : index
    %c0_67 = arith.constant 0 : index
    %92 = vector.load %arg7[%c0_66, %c0_67] : memref<1x640xf32, #tpu.memory_space<vmem>>, vector<1x640xf32>
    %93 = vector.broadcast %92 : vector<1x640xf32> to vector<8x640xf32>
    %94 = arith.addf %91, %93 : vector<8x640xf32>
    %c0_68 = arith.constant 0 : index
    %c0_69 = arith.constant 0 : index
    %95 = vector.load %arg8[%c0_68, %c0_69] : memref<8x640xf32, #tpu.memory_space<vmem>>, vector<8x640xf32>
    tpu.vector_store %arg8[%c0_68, %c0_69], %94 {strides = array<i32>} : memref<8x640xf32, #tpu.memory_space<vmem>>, vector<8x640xf32>,
    return
  }
  func.func @transform_0(%arg0: i32) -> (i32, i32) {
    %c0_i32 = arith.constant 0 : i32
    %c0_i32_0 = arith.constant 0 : i32
    return %arg0, %c0_i32 : i32, i32
  }
  func.func @transform_1(%arg0: i32) -> (i32, i32) {
    %c0_i32 = arith.constant 0 : i32
    %c0_i32_0 = arith.constant 0 : i32
    %c0_i32_1 = arith.constant 0 : i32
    return %c0_i32, %c0_i32_0 : i32, i32
  }
  func.func @transform_2(%arg0: i32) -> (i32, i32) {
    %c0_i32 = arith.constant 0 : i32
    %c0_i32_0 = arith.constant 0 : i32
    %c0_i32_1 = arith.constant 0 : i32
    return %c0_i32, %c0_i32_0 : i32, i32
  }
  func.func @transform_3(%arg0: i32) -> (i32, i32, i32) {
    %c0_i32 = arith.constant 0 : i32
    %c0_i32_0 = arith.constant 0 : i32
    %c0_i32_1 = arith.constant 0 : i32
    %c0_i32_2 = arith.constant 0 : i32
    return %c0_i32, %c0_i32_0, %c0_i32_1 : i32, i32, i32
  }
  func.func @transform_4(%arg0: i32) -> (i32, i32, i32) {
    %c0_i32 = arith.constant 0 : i32
    %c0_i32_0 = arith.constant 0 : i32
    %c0_i32_1 = arith.constant 0 : i32
    %c0_i32_2 = arith.constant 0 : i32
    return %c0_i32, %c0_i32_0, %c0_i32_1 : i32, i32, i32
  }
  func.func @transform_5(%arg0: i32) -> (i32, i32) {
    %c0_i32 = arith.constant 0 : i32
    %c0_i32_0 = arith.constant 0 : i32
    %c0_i32_1 = arith.constant 0 : i32
    return %c0_i32, %c0_i32_0 : i32, i32
  }
  func.func @transform_6(%arg0: i32) -> (i32, i32) {
    %c0_i32 = arith.constant 0 : i32
    %c0_i32_0 = arith.constant 0 : i32
    %c0_i32_1 = arith.constant 0 : i32
    return %c0_i32, %c0_i32_0 : i32, i32
  }
  func.func @transform_7(%arg0: i32) -> (i32, i32) {
    %c0_i32 = arith.constant 0 : i32
    %c0_i32_0 = arith.constant 0 : i32
    return %arg0, %c0_i32 : i32, i32
  }
}

</mosaic_0001>

<bundles_post_ra>
// kernel: tpu_custom_call.1
= control target key start
LH: loop header
LB: loop body
LE: loop exit
PB: predicated region body
PF: predicated region fallthrough
CT: control target
= control target key end

     0   :  { %12 = vsyncpa [#allocation3], 0  ;;  %s2917_s0 = inlined_call_operand.hbm [shape: f32[8,640], index: 0, kind: input, shape index: {}]   ;;  %s2918_s1 = inlined_call_operand.hbm [shape: bf16[640,128], index: 1, kind: input, shape index: {}]   ;;  %s2919_s2 = inlined_call_operand.vmem [shape: f32[1,128], index: 2, kind: input, shape index: {}]   ;;  %s2920_s3 = inlined_call_operand.hbm [shape: bf16[8,128,128], index: 3, kind: input, shape index: {}]   ;;  %s2921_s4 = inlined_call_operand.vmem [shape: f32[8,1,128], index: 4, kind: input, shape index: {}]   ;;  %s2922_s5 = inlined_call_operand.hbm [shape: bf16[128,640], index: 5, kind: input, shape index: {}]   ;;  %s2923_s6 = inlined_call_operand.vmem [shape: f32[1,640], index: 6, kind: input, shape index: {}]   ;;  %s2924_s7 = inlined_call_operand.hbm [shape: f32[8,640], index: 7, kind: output, shape index: {}]  }
   0x1   :  { %13 = vsyncpa [#allocation6], 0 }
   0x2   :  { %14 = vsyncpa [#allocation9], 0 }
   0x3   :  { %15 = vsyncpa [#allocation4], 0  ;;  %s2669_s24 = smov [#allocation5]   ;;  %s2551_s28 = scalar_lea.hbm %s2918_s1, 5120 }
   0x4   :  { %s31_s25 = sshll.u32 %s2669_s24, 4  ;;  %p2552_p0 = scmp.ne.s32.totalorder %s2918_s1, %s2551_s28  ;;  %s32_s25 = int_to_ptr.vmem [resolvable:$true] %s31_s25 }
   0x5   :  { %p2555_p1 = scmp.lt.u32.totalorder %s2551_s28, %s2918_s1 }
   0x7   :  { %p2557_p2 = pnand %p2555_p1, %p2552_p0 }
   0x9   :  { %2560 = shalt.err (!%p2557_p2)
}
   0xa   :  { %s2561_s10 = scalar_lea.vmem %s32_s25, 5120  ;;  %p2566_p4 = scmp.lt.s32.totalorder %s32_s25, %s32_s25 }
   0xb   :  { %p2562_p3 = scmp.ne.s32.totalorder %s32_s25, %s2561_s10  ;;  %p2567_p5 = scmp.lt.s32.totalorder %s2561_s10, %s2561_s10 }
   0xd   :  { %p2568_p6 = por %p2567_p5, %p2566_p4 }
   0xf   :  { %p2569_p7 = pnand %p2568_p6, %p2562_p3 }
  0x11   :  { %2572 = shalt.err (!%p2569_p7)
}
  0x12   :  { %s2670_s11 = smov 64   ;;  %s2671_s12 = smov 4  }
  0x13   :  { %37 = dma.hbm_to_vmem [thread:$0]  %s2918_s1, 5120, %s32_s25, [#allocation6], %s2670_s11, %s2670_s11, %s2671_s12  }
  0x14   :  { %s2672_s15 = smov [#allocation2]   ;;  %s2673_s17 = smov [#allocation7]  }
  0x15   :  { %s22_s16 = sshll.u32 %s2672_s15, 4  ;;  %s45_s18 = sshll.u32 %s2673_s17, 4  ;;  %s23_s16 = int_to_ptr.vmem [resolvable:$true] %s22_s16  ;;  %s46_s18 = int_to_ptr.vmem [resolvable:$true] %s45_s18 }
  0x16   :  { %s2573_s21 = scalar_lea.hbm %s2917_s0, 640 }
  0x17   :  { %p2574_p8 = scmp.ne.s32.totalorder %s2917_s0, %s2573_s21  ;;  %p2577_p9 = scmp.lt.u32.totalorder %s2573_s21, %s2917_s0 }
  0x19   :  { %p2579_p10 = pnand %p2577_p9, %p2574_p8 }
  0x1b   :  { %2582 = shalt.err (!%p2579_p10)
}
  0x1c   :  { %s2583_s1 = scalar_lea.vmem %s23_s16, 640  ;;  %p2588_p12 = scmp.lt.s32.totalorder %s23_s16, %s23_s16 }
  0x1d   :  { %p2584_p11 = scmp.ne.s32.totalorder %s23_s16, %s2583_s1  ;;  %p2589_p13 = scmp.lt.s32.totalorder %s2583_s1, %s2583_s1 }
  0x1f   :  { %p2590_p0 = por %p2589_p13, %p2588_p12 }
  0x21   :  { %p2591_p1 = pnand %p2590_p0, %p2584_p11 }
  0x23   :  { %2594 = shalt.err (!%p2591_p1)
}
  0x24   :  { %25 = dma.hbm_to_vmem [thread:$0]  %s2917_s0, 640, %s23_s16, [#allocation3]  }
  0x25   :  { %s2595_s30 = scalar_lea.hbm %s2920_s3, 8192 }
  0x26   :  { %p2596_p2 = scmp.ne.s32.totalorder %s2920_s3, %s2595_s30  ;;  %p2599_p3 = scmp.lt.u32.totalorder %s2595_s30, %s2920_s3 }
  0x28   :  { %p2601_p4 = pnand %p2599_p3, %p2596_p2 }
  0x2a   :  { %2604 = shalt.err (!%p2601_p4)
}
  0x2b   :  { %s2605_s14 = scalar_lea.vmem %s46_s18, 8192  ;;  %p2610_p6 = scmp.lt.s32.totalorder %s46_s18, %s46_s18 }
  0x2c   :  { %p2606_p5 = scmp.ne.s32.totalorder %s46_s18, %s2605_s14  ;;  %p2611_p7 = scmp.lt.s32.totalorder %s2605_s14, %s2605_s14 }
  0x2e   :  { %p2612_p8 = por %p2611_p7, %p2610_p6 }
  0x30   :  { %p2613_p9 = pnand %p2612_p8, %p2606_p5 }
  0x32   :  { %2616 = shalt.err (!%p2613_p9)
}
  0x33   :  { %51 = dma.hbm_to_vmem [thread:$0]  %s2920_s3, 8192, %s46_s18, [#allocation6], %s2670_s11, %s2670_s11, %s2671_s12  }
  0x34   :  { %s2674_s16 = smov [#allocation8]   ;;  %s2617_s21 = scalar_lea.hbm %s2922_s5, 5120 }
  0x35   :  { %s59_s17 = sshll.u32 %s2674_s16, 4  ;;  %p2618_p10 = scmp.ne.s32.totalorder %s2922_s5, %s2617_s21  ;;  %s60_s17 = int_to_ptr.vmem [resolvable:$true] %s59_s17 }
  0x36   :  { %p2621_p11 = scmp.lt.u32.totalorder %s2617_s21, %s2922_s5 }
  0x38   :  { %p2623_p12 = pnand %p2621_p11, %p2618_p10 }
  0x3a   :  { %2626 = shalt.err (!%p2623_p12)
}
  0x3b   :  { %s2627_s1 = scalar_lea.vmem %s60_s17, 5120  ;;  %p2632_p0 = scmp.lt.s32.totalorder %s60_s17, %s60_s17 }
  0x3c   :  { %p2628_p13 = scmp.ne.s32.totalorder %s60_s17, %s2627_s1  ;;  %p2633_p1 = scmp.lt.s32.totalorder %s2627_s1, %s2627_s1 }
  0x3e   :  { %p2634_p2 = por %p2633_p1, %p2632_p0 }
  0x40   :  { %p2635_p3 = pnand %p2634_p2, %p2628_p13 }
  0x42   :  { %2638 = shalt.err (!%p2635_p3)
}
  0x43   :  { %s2675_s3 = smov 320   ;;  %s2676_s11 = smov 20  }
  0x44   :  { %65 = dma.hbm_to_vmem [thread:$0]  %s2922_s5, 5120, %s60_s17, [#allocation9], %s2675_s3, %s2675_s3, %s2676_s11  }
  0x45   :  { %2661 = dma.done.wait [#allocation3], 640  }
  0x46   :  { %2662 = vsyncadd [#allocation3], 4294966656 }
  0x47   :  { %2663 = dma.done.wait [#allocation6], 13312  }
  0x48   :  { %2664 = vsyncadd [#allocation6], 4294953984 }
  0x49   :  { %2665 = dma.done.wait [#allocation9], 5120  }
  0x4a   :  { %2666 = vsyncadd [#allocation9], 4294962176  ;;  %v2391_v0 = vld [vmem:[#allocation5 + $0x40] sm:$0xff]   ;;  %v2395_v4 = vld [vmem:[#allocation5 + $0x48] sm:$0xff]   ;;  %v2677_v35 = vmov 0.0   ;;  %vm2678_vm0 = vmmov 0  }
  0x4b   :  { %v2392_v1 = vld [vmem:[#allocation5] sm:$0xff]   ;;  %2045 = vmatprep.subr.bf16.mxu0 %v2391_v0  ;;  %v2396_v5 = vld [vmem:[#allocation5 + $0x8] sm:$0xff]   ;;  %v2399_v8 = vld [vmem:[#allocation5 + $0x50] sm:$0xff]  }
  0x4c   :  { %v2393_v2 = vld [vmem:[#allocation5 + $0xc0] sm:$0xff]   ;;  %2046 = vmatpush3.bf16.msra.mxu0 %v2392_v1  ;;  %v2397_v6 = vld [vmem:[#allocation5 + $0xc8] sm:$0xff]   ;;  %v2400_v9 = vld [vmem:[#allocation5 + $0x10] sm:$0xff]  }
  0x4d   :  { %v2394_v3 = vld [vmem:[#allocation5 + $0x80] sm:$0xff]   ;;  %2067 = vmatprep.subr.bf16.mxu1 %v2393_v2  ;;  %2047 = vmatprep.subr.bf16.mxu0 %v2395_v4  ;;  %v2398_v7 = vld [vmem:[#allocation5 + $0x88] sm:$0xff]   ;;  %v2401_v10 = vld [vmem:[#allocation5 + $0xd0] sm:$0xff]  }
  0x4e   :  { %2068 = vmatpush3.bf16.msra.mxu1 %v2394_v3  ;;  %v2402_v11 = vld [vmem:[#allocation5 + $0x90] sm:$0xff]   ;;  %v2403_v12 = vld [vmem:[#allocation5 + $0x58] sm:$0xff]   ;;  %v2407_v16 = vld [vmem:[#allocation5 + $0x60] sm:$0xff]  }
  0x4f   :  { %2069 = vmatprep.subr.bf16.mxu1 %v2397_v6  ;;  %v2404_v13 = vld [vmem:[#allocation5 + $0x18] sm:$0xff]   ;;  %v2408_v17 = vld [vmem:[#allocation5 + $0x20] sm:$0xff]   ;;  %v2411_v20 = vld [vmem:[#allocation5 + $0x68] sm:$0xff]  }
  0x50   :  { %2048 = vmatpush3.bf16.msra.mxu0 %v2396_v5  ;;  %v2405_v14 = vld [vmem:[#allocation5 + $0xd8] sm:$0xff]   ;;  %v2409_v18 = vld [vmem:[#allocation5 + $0xe0] sm:$0xff]   ;;  %v2412_v21 = vld [vmem:[#allocation5 + $0x28] sm:$0xff]  }
  0x51   :  { %2049 = vmatprep.subr.bf16.mxu0 %v2399_v8  ;;  %v2406_v15 = vld [vmem:[#allocation5 + $0x98] sm:$0xff]   ;;  %v2410_v19 = vld [vmem:[#allocation5 + $0xa0] sm:$0xff]   ;;  %v2413_v22 = vld [vmem:[#allocation5 + $0xe8] sm:$0xff]  }
  0x52   :  { %2070 = vmatpush3.bf16.msra.mxu1 %v2398_v7  ;;  %v2414_v23 = vld [vmem:[#allocation5 + $0xa8] sm:$0xff]   ;;  %v2415_v24 = vld [vmem:[#allocation5 + $0x70] sm:$0xff]   ;;  %v2419_v28 = vld [vmem:[#allocation5 + $0x78] sm:$0xff]  }
  0x53   :  { %2071 = vmatprep.subr.bf16.mxu1 %v2401_v10  ;;  %v2416_v25 = vld [vmem:[#allocation5 + $0x30] sm:$0xff]   ;;  %v2420_v29 = vld [vmem:[#allocation5 + $0x38] sm:$0xff]   ;;  %v82_v31 = vld [vmem:[#allocation2 + $0x8] sm:$0xff] }
  0x54   :  { %2050 = vmatpush3.bf16.msra.mxu0 %v2400_v9  ;;  %v2417_v26 = vld [vmem:[#allocation5 + $0xf0] sm:$0xff]   ;;  %v2421_v30 = vld [vmem:[#allocation5 + $0xf8] sm:$0xff]   ;;  %v87_v32 = vpack.c.bf16 %v82_v31, %v82_v31  ;;  %v2423_v39 = vld [vmem:[#allocation5 + $0x100] sm:$0xff]  }
  0x55   :  { %2051 = vmatprep.subr.bf16.mxu0 %v2403_v12  ;;  %v2418_v27 = vld [vmem:[#allocation5 + $0xb0] sm:$0xff]   ;;  %v2422_v33 = vld [vmem:[#allocation5 + $0xb8] sm:$0xff]   ;;  %v83_v40 = vld [vmem:[#allocation2 + $0x10] sm:$0xff] }
  0x56   :  { %2072 = vmatpush3.bf16.msra.mxu1 %v2402_v11  ;;  %v81_v34 = vld [vmem:[#allocation2] sm:$0xff]  ;;  %v84_v36 = vld [vmem:[#allocation2 + $0x18] sm:$0xff]  ;;  %450 = vmatprep.mubr.bf16.mxu0 %v87_v32  ;;  %v88_v41 = vpack.c.bf16 %v83_v40, %v83_v40  ;;  %v2424_v42 = vld [vmem:[#allocation5 + $0x108] sm:$0xff]  }
  0x57   :  { %2073 = vmatprep.subr.bf16.mxu1 %v2405_v14  ;;  %v86_v37 = vpack.c.bf16 %v81_v34, %v81_v34  ;;  %v89_v38 = vpack.c.bf16 %v84_v36, %v84_v36  ;;  %v2425_v43 = vld [vmem:[#allocation5 + $0x110] sm:$0xff]   ;;  %v2426_v44 = vld [vmem:[#allocation5 + $0x118] sm:$0xff]   ;;  %v2427_v45 = vld [vmem:[#allocation5 + $0x120] sm:$0xff]  }
  0x58   :  { %2052 = vmatpush3.bf16.msra.mxu0 %v2404_v13  ;;  %v2428_v46 = vld [vmem:[#allocation5 + $0x128] sm:$0xff]   ;;  %v2429_v47 = vld [vmem:[#allocation5 + $0x130] sm:$0xff]   ;;  %v2430_v48 = vld [vmem:[#allocation5 + $0x138] sm:$0xff]  }
  0x59   :  { %2053 = vmatprep.subr.bf16.mxu0 %v2407_v16  ;;  %490 = vmatprep.mubr.bf16.mxu1 %v89_v38  ;;  %v85_v49 = vld [vmem:[#allocation2 + $0x20] sm:$0xff]  ;;  %v2431_v51 = vld [vmem:[#allocation7] sm:$0xff]   ;;  %v2432_v52 = vld [vmem:[#allocation7 + $0x8] sm:$0xff]  }
  0x5a   :  { %2074 = vmatpush3.bf16.msra.mxu1 %v2406_v15  ;;  %v90_v50 = vpack.c.bf16 %v85_v49, %v85_v49  ;;  %v2433_v53 = vld [vmem:[#allocation7 + $0x10] sm:$0xff]   ;;  %v2434_v54 = vld [vmem:[#allocation7 + $0x18] sm:$0xff]   ;;  %v2435_v55 = vld [vmem:[#allocation7 + $0x20] sm:$0xff]  }
  0x5b   :  { %2075 = vmatprep.subr.bf16.mxu1 %v2409_v18  ;;  %v2436_v56 = vld [vmem:[#allocation7 + $0x28] sm:$0xff]   ;;  %v2437_v57 = vld [vmem:[#allocation7 + $0x30] sm:$0xff]   ;;  %v2438_v58 = vld [vmem:[#allocation7 + $0x38] sm:$0xff]  }
  0x5c   :  { %2054 = vmatpush3.bf16.msra.mxu0 %v2408_v17  ;;  %v2439_v59 = vld [vmem:[#allocation7 + $0x40] sm:$0xff]   ;;  %v2440_v60 = vld [vmem:[#allocation7 + $0x48] sm:$0xff]   ;;  %v2441_v61 = vld [vmem:[#allocation7 + $0x50] sm:$0xff]  }
  0x5d   :  { %2055 = vmatprep.subr.bf16.mxu0 %v2411_v20  ;;  %v2442_v62 = vld [vmem:[#allocation7 + $0x58] sm:$0xff]   ;;  %v2443_v63 = vld [vmem:[#allocation7 + $0x60] sm:$0xff]   ;;  %v2444_v0 = vld [vmem:[#allocation7 + $0x68] sm:$0xff]  }
  0x5e   :  { %2076 = vmatpush3.bf16.msra.mxu1 %v2410_v19  ;;  %v1885_v2 = vld [vmem:[%s2919_s2] ss:$0 sm:$0xff]  ;;  %v2453_v38 = vld [vmem:[#allocation7 + $0xb0] sm:$0xff]   ;;  %v2455_v40 = vld [vmem:[#allocation7 + $0xc0] sm:$0xff]  }
  0x5f   :  { %2077 = vmatprep.subr.bf16.mxu1 %v2413_v22  ;;  %v2446_v22 = vld [vmem:[#allocation7 + $0x78] sm:$0xff]  }
  0x60   :  { %2056 = vmatpush3.bf16.msra.mxu0 %v2412_v21  ;;  %v2445_v21 = vld [vmem:[#allocation7 + $0x70] sm:$0xff]  }
  0x61   :  { %2057 = vmatprep.subr.bf16.mxu0 %v2415_v24  ;;  %v2448_v24 = vld [vmem:[#allocation7 + $0x88] sm:$0xff]  }
  0x62   :  { %2078 = vmatpush3.bf16.msra.mxu1 %v2414_v23  ;;  %v2447_v23 = vld [vmem:[#allocation7 + $0x80] sm:$0xff]  }
  0x63   :  { %2079 = vmatprep.subr.bf16.mxu1 %v2417_v26  ;;  %v2450_v26 = vld [vmem:[#allocation7 + $0x98] sm:$0xff]  }
  0x64   :  { %2058 = vmatpush3.bf16.msra.mxu0 %v2416_v25  ;;  %v2449_v25 = vld [vmem:[#allocation7 + $0x90] sm:$0xff]  }
  0x65   :  { %2059 = vmatprep.subr.bf16.mxu0 %v2419_v28  ;;  %v2452_v28 = vld [vmem:[#allocation7 + $0xa8] sm:$0xff]  }
  0x66   :  { %2080 = vmatpush3.bf16.msra.mxu1 %v2418_v27  ;;  %v2451_v27 = vld [vmem:[#allocation7 + $0xa0] sm:$0xff]  }
  0x67   :  { %2081 = vmatprep.subr.bf16.mxu1 %v2421_v30 }
  0x68   :  { %2060 = vmatpush3.bf16.msra.mxu0 %v2420_v29  ;;  %v1926_v29 = vld [vmem:[%s2921_s4] ss:$0 sm:$0xff] }
  0x69   :  { %2179 = vmatprep.subr.bf16.mxu0 %v2677_v35 }
  0x6a   :  { %2082 = vmatpush3.bf16.msra.mxu1 %v2422_v33 }
  0x6b   :  { %451 = vmatmul.mubr.bf16.vlgmr.msra.gmra.mrb[0].mxu0 %v86_v37  ;;  %2199 = vmatprep.subr.bf16.mxu1 %v2677_v35 }
  0x6c   :  { %2180 = vmatpush3.bf16.msra.mxu0 %v2423_v39  ;;  %2195 = vmatprep.mubr.msk.bf16.mxu0 %vm2678_vm0, %v2677_v35  ;;  %v2454_v39 = vld [vmem:[#allocation7 + $0xb8] sm:$0xff]  }
  0x6d   :  { %491 = vmatmul.mubr.bf16.vlgmr.msra.gmra.mrb[0].mxu1 %v88_v41  ;;  %2181 = vmatprep.subr.bf16.mxu0 %v2677_v35  ;;  %v2456_v41 = vld [vmem:[#allocation7 + $0xc8] sm:$0xff]  }
  0x6e   :  { %2215 = vmatprep.mubr.msk.bf16.mxu1 %vm2678_vm0, %v2677_v35  ;;  %2200 = vmatpush3.bf16.msra.mxu1 %v2431_v51 }
  0x6f   :  { %2201 = vmatprep.subr.bf16.mxu1 %v2677_v35 }
  0x70   :  { %2182 = vmatpush3.bf16.msra.mxu0 %v2424_v42  ;;  %v2457_v42 = vld [vmem:[#allocation7 + $0xd0] sm:$0xff]  }
  0x71   :  { %2183 = vmatprep.subr.bf16.mxu0 %v2677_v35 }
  0x72   :  { %2202 = vmatpush3.bf16.msra.mxu1 %v2432_v52 }
  0x73   :  { %2203 = vmatprep.subr.bf16.mxu1 %v2677_v35 }
  0x74   :  { %2184 = vmatpush3.bf16.msra.mxu0 %v2425_v43  ;;  %v2458_v43 = vld [vmem:[#allocation7 + $0xd8] sm:$0xff]  }
  0x75   :  { %2185 = vmatprep.subr.bf16.mxu0 %v2677_v35 }
  0x76   :  { %2204 = vmatpush3.bf16.msra.mxu1 %v2433_v53 }
  0x77   :  { %2205 = vmatprep.subr.bf16.mxu1 %v2677_v35 }
  0x78   :  { %2186 = vmatpush3.bf16.msra.mxu0 %v2426_v44  ;;  %v2459_v44 = vld [vmem:[#allocation7 + $0xe0] sm:$0xff]  }
  0x79   :  { %2187 = vmatprep.subr.bf16.mxu0 %v2677_v35 }
  0x7a   :  { %2206 = vmatpush3.bf16.msra.mxu1 %v2434_v54  ;;  %v2461_v54 = vld [vmem:[#allocation7 + $0xf0] sm:$0xff]  }
  0x7b   :  { %2207 = vmatprep.subr.bf16.mxu1 %v2677_v35 }
  0x7c   :  { %2188 = vmatpush3.bf16.msra.mxu0 %v2427_v45  ;;  %v2460_v45 = vld [vmem:[#allocation7 + $0xe8] sm:$0xff]  }
  0x7d   :  { %2189 = vmatprep.subr.bf16.mxu0 %v2677_v35 }
  0x7e   :  { %2208 = vmatpush3.bf16.msra.mxu1 %v2435_v55  ;;  %v2462_v55 = vld [vmem:[#allocation7 + $0xf8] sm:$0xff]  }
  0x7f   :  { %2209 = vmatprep.subr.bf16.mxu1 %v2677_v35 }
  0x80   :  { %2190 = vmatpush3.bf16.msra.mxu0 %v2428_v46  ;;  %v1936_v46 = vld [vmem:[%s2921_s4 + $0x1] ss:$0 sm:$0xff] }
  0x81   :  { %2191 = vmatprep.subr.bf16.mxu0 %v2677_v35 }
  0x82   :  { %2210 = vmatpush3.bf16.msra.mxu1 %v2436_v56  ;;  %v2463_v56 = vld [vmem:[#allocation7 + $0x100] sm:$0xff]  }
  0x83   :  { %2211 = vmatprep.subr.bf16.mxu1 %v2677_v35 }
  0x84   :  { %2192 = vmatpush3.bf16.msra.mxu0 %v2429_v47 }
  0x85   :  { %2193 = vmatprep.subr.bf16.mxu0 %v2677_v35 }
  0x86   :  { %2212 = vmatpush3.bf16.msra.mxu1 %v2437_v57  ;;  %v2464_v57 = vld [vmem:[#allocation7 + $0x108] sm:$0xff]  }
  0x87   :  { %2213 = vmatprep.subr.bf16.mxu1 %v2677_v35 }
  0x88   :  { %2194 = vmatpush3.bf16.msra.mxu0 %v2430_v48 }
  0x89   :  { %2219 = vmatprep.subr.bf16.mxu0 %v2677_v35 }
  0x8a   :  { %2214 = vmatpush3.bf16.msra.mxu1 %v2438_v58  ;;  %v2465_v58 = vld [vmem:[#allocation7 + $0x110] sm:$0xff]  }
  0x8b   :  { %2196 = vmatmul.mubr.bf16.vlgmr.msra.gmra.mrb[4].mxu0 %v90_v50  ;;  %2239 = vmatprep.subr.bf16.mxu1 %v2677_v35 }
  0x8c   :  { %2235 = vmatprep.mubr.msk.bf16.mxu0 %vm2678_vm0, %v2677_v35  ;;  %2220 = vmatpush3.bf16.msra.mxu0 %v2439_v59  ;;  %v2466_v59 = vld [vmem:[#allocation7 + $0x118] sm:$0xff]  }
  0x8d   :  { %2221 = vmatprep.subr.bf16.mxu0 %v2677_v35 }
  0x90   :  { %2222 = vmatpush3.bf16.msra.mxu0 %v2440_v60  ;;  %v2467_v60 = vld [vmem:[#allocation7 + $0x120] sm:$0xff]  }
  0x91   :  { %2223 = vmatprep.subr.bf16.mxu0 %v2677_v35 }
  0x94   :  { %2224 = vmatpush3.bf16.msra.mxu0 %v2441_v61  ;;  %v2468_v61 = vld [vmem:[#allocation7 + $0x128] sm:$0xff]  }
  0x95   :  { %2225 = vmatprep.subr.bf16.mxu0 %v2677_v35 }
  0x98   :  { %2226 = vmatpush3.bf16.msra.mxu0 %v2442_v62  ;;  %v1946_v62 = vld [vmem:[%s2921_s4 + $0x2] ss:$0 sm:$0xff] }
  0x99   :  { %2227 = vmatprep.subr.bf16.mxu0 %v2677_v35 }
  0x9c   :  { %2228 = vmatpush3.bf16.msra.mxu0 %v2443_v63 }
  0x9d   :  { %2229 = vmatprep.subr.bf16.mxu0 %v2677_v35 }
  0xa0   :  { %2230 = vmatpush3.bf16.msra.mxu0 %v2444_v0 }
  0xa1   :  { %2231 = vmatprep.subr.bf16.mxu0 %v2677_v35 }
  0xa4   :  { %2232 = vmatpush3.bf16.msra.mxu0 %v2445_v21 }
  0xa5   :  { %2233 = vmatprep.subr.bf16.mxu0 %v2677_v35 }
  0xa8   :  { %2234 = vmatpush3.bf16.msra.mxu0 %v2446_v22  ;;  %v2477_v22 = vld [vmem:[#allocation7 + $0x170] sm:$0xff]  }
  0xa9   :  { %2259 = vmatprep.subr.bf16.mxu0 %v2677_v35 }
 0x13e   :  { %v2061_v1 = vpop.f32.mrb[0].mxu0 }
 0x13f   :  { %v2062_v3 = vpop.f32.mrb[1].mxu0 }
 0x140   :  { %v2063_v4 = vadd.f32 %v2062_v3, %v2061_v1  ;;  %v2064_v5 = vpop.f32.mrb[2].mxu0  ;;  %v2083_v6 = vpop.f32.mrb[0].mxu1 }
 0x141   :  { %v2065_v7 = vpop.f32.mrb[3].mxu0  ;;  %v2084_v8 = vpop.f32.mrb[1].mxu1 }
 0x142   :  { %v453_v9 = vadd.f32 %v2063_v4, %v1885_v2  ;;  %v2085_v10 = vadd.f32 %v2084_v8, %v2083_v6  ;;  %v2086_v11 = vpop.f32.mrb[2].mxu1  ;;  %v2469_v6 = vld [vmem:[#allocation7 + $0x130] sm:$0xff]   ;;  %v2470_v7 = vld [vmem:[#allocation7 + $0x138] sm:$0xff]   ;;  %v2471_v8 = vld [vmem:[#allocation7 + $0x140] sm:$0xff]  }
 0x143   :  { %v2087_v12 = vpop.f32.mrb[3].mxu1  ;;  %v2474_v11 = vld [vmem:[#allocation7 + $0x158] sm:$0xff]  }
 0x144   :  { %v493_v13 = vadd.f32 %v2085_v10, %v453_v9  ;;  %v2472_v9 = vld [vmem:[#allocation7 + $0x148] sm:$0xff]   ;;  %v2473_v10 = vld [vmem:[#allocation7 + $0x150] sm:$0xff]   ;;  %v2475_v12 = vld [vmem:[#allocation7 + $0x160] sm:$0xff]  }
 0x15e   :  { %v532_v14 = vpop.f32.mrb[4].mxu0 }
 0x15f   :  { %v533_v15 = vadd.f32 %v532_v14, %v493_v13  ;;  %v2197_v16 = vpop.f32.mrb[5].mxu0  ;;  %v2476_v13 = vld [vmem:[#allocation7 + $0x168] sm:$0xff]   ;;  %v1956_v14 = vld [vmem:[%s2921_s4 + $0x3] ss:$0 sm:$0xff] }
 0x160   :  { %v535_v17 = vpop.f32.mrb[6].mxu0 }
 0x161   :  { %v538_v18 = vmax.f32 %v533_v15, 0.0  ;;  %v2198_v19 = vpop.f32.mrb[7].mxu0 }
 0x163   :  { %v556_v20 = vpack.c.bf16 %v538_v18, %v538_v18 }
 0x165   :  { %2216 = vmatmul.mubr.bf16.vlgmr.msra.gmra.mrb[4].mxu1 %v556_v20 }
 0x166   :  { %2255 = vmatprep.mubr.msk.bf16.mxu1 %vm2678_vm0, %v2677_v35  ;;  %2240 = vmatpush3.bf16.msra.mxu1 %v2447_v23  ;;  %v2478_v23 = vld [vmem:[#allocation7 + $0x178] sm:$0xff]  }
 0x167   :  { %2241 = vmatprep.subr.bf16.mxu1 %v2677_v35 }
 0x16a   :  { %2242 = vmatpush3.bf16.msra.mxu1 %v2448_v24  ;;  %v2479_v24 = vld [vmem:[#allocation7 + $0x180] sm:$0xff]  }
 0x16b   :  { %2243 = vmatprep.subr.bf16.mxu1 %v2677_v35 }
 0x16e   :  { %2244 = vmatpush3.bf16.msra.mxu1 %v2449_v25  ;;  %v2480_v25 = vld [vmem:[#allocation7 + $0x188] sm:$0xff]  }
 0x16f   :  { %2245 = vmatprep.subr.bf16.mxu1 %v2677_v35 }
 0x172   :  { %2246 = vmatpush3.bf16.msra.mxu1 %v2450_v26  ;;  %v2481_v26 = vld [vmem:[#allocation7 + $0x190] sm:$0xff]  }
 0x173   :  { %2247 = vmatprep.subr.bf16.mxu1 %v2677_v35 }
 0x176   :  { %2248 = vmatpush3.bf16.msra.mxu1 %v2451_v27  ;;  %v2482_v27 = vld [vmem:[#allocation7 + $0x198] sm:$0xff]  }
 0x177   :  { %2249 = vmatprep.subr.bf16.mxu1 %v2677_v35 }
 0x17a   :  { %2250 = vmatpush3.bf16.msra.mxu1 %v2452_v28  ;;  %v2483_v28 = vld [vmem:[#allocation7 + $0x1a0] sm:$0xff]  }
 0x17b   :  { %2251 = vmatprep.subr.bf16.mxu1 %v2677_v35 }
 0x17e   :  { %2252 = vmatpush3.bf16.msra.mxu1 %v2453_v38 }
 0x17f   :  { %2253 = vmatprep.subr.bf16.mxu1 %v2677_v35 }
 0x182   :  { %2254 = vmatpush3.bf16.msra.mxu1 %v2454_v39  ;;  %v2485_v39 = vld [vmem:[#allocation7 + $0x1b0] sm:$0xff]  }
 0x183   :  { %2279 = vmatprep.subr.bf16.mxu1 %v2677_v35 }
 0x238   :  { %v645_v30 = vpop.f32.mrb[4].mxu1 }
 0x239   :  { %v646_v31 = vadd.f32 %v1926_v29, %v645_v30  ;;  %v2217_v32 = vpop.f32.mrb[5].mxu1  ;;  %v2484_v29 = vld [vmem:[#allocation7 + $0x1a8] sm:$0xff]   ;;  %v1966_v30 = vld [vmem:[%s2921_s4 + $0x4] ss:$0 sm:$0xff] }
 0x23a   :  { %v648_v33 = vpop.f32.mrb[6].mxu1 }
 0x23b   :  { %v651_v34 = vmax.f32 %v646_v31, 0.0  ;;  %v2218_v36 = vpop.f32.mrb[7].mxu1 }
 0x23d   :  { %v671_v37 = vpack.c.bf16 %v651_v34, %v651_v34 }
 0x23f   :  { %2236 = vmatmul.mubr.bf16.vlgmr.msra.gmra.mrb[8].mxu0 %v671_v37 }
 0x240   :  { %2275 = vmatprep.mubr.msk.bf16.mxu0 %vm2678_vm0, %v2677_v35  ;;  %2260 = vmatpush3.bf16.msra.mxu0 %v2455_v40  ;;  %v2486_v40 = vld [vmem:[#allocation7 + $0x1b8] sm:$0xff]  }
 0x241   :  { %2261 = vmatprep.subr.bf16.mxu0 %v2677_v35 }
 0x244   :  { %2262 = vmatpush3.bf16.msra.mxu0 %v2456_v41  ;;  %v2487_v41 = vld [vmem:[#allocation7 + $0x1c0] sm:$0xff]  }
 0x245   :  { %2263 = vmatprep.subr.bf16.mxu0 %v2677_v35 }
 0x248   :  { %2264 = vmatpush3.bf16.msra.mxu0 %v2457_v42  ;;  %v2488_v42 = vld [vmem:[#allocation7 + $0x1c8] sm:$0xff]  }
 0x249   :  { %2265 = vmatprep.subr.bf16.mxu0 %v2677_v35 }
 0x24c   :  { %2266 = vmatpush3.bf16.msra.mxu0 %v2458_v43  ;;  %v2489_v43 = vld [vmem:[#allocation7 + $0x1d0] sm:$0xff]  }
 0x24d   :  { %2267 = vmatprep.subr.bf16.mxu0 %v2677_v35 }
 0x250   :  { %2268 = vmatpush3.bf16.msra.mxu0 %v2459_v44  ;;  %v2490_v44 = vld [vmem:[#allocation7 + $0x1d8] sm:$0xff]  }
 0x251   :  { %2269 = vmatprep.subr.bf16.mxu0 %v2677_v35 }
 0x254   :  { %2270 = vmatpush3.bf16.msra.mxu0 %v2460_v45  ;;  %v2491_v45 = vld [vmem:[#allocation7 + $0x1e0] sm:$0xff]  }
 0x255   :  { %2271 = vmatprep.subr.bf16.mxu0 %v2677_v35 }
 0x258   :  { %2272 = vmatpush3.bf16.msra.mxu0 %v2461_v54 }
 0x259   :  { %2273 = vmatprep.subr.bf16.mxu0 %v2677_v35 }
 0x25c   :  { %2274 = vmatpush3.bf16.msra.mxu0 %v2462_v55  ;;  %v2493_v55 = vld [vmem:[#allocation7 + $0x1f0] sm:$0xff]  }
 0x25d   :  { %2299 = vmatprep.subr.bf16.mxu0 %v2677_v35 }
 0x312   :  { %v760_v47 = vpop.f32.mrb[8].mxu0 }
 0x313   :  { %v761_v48 = vadd.f32 %v1936_v46, %v760_v47  ;;  %v2237_v49 = vpop.f32.mrb[9].mxu0  ;;  %v2492_v46 = vld [vmem:[#allocation7 + $0x1e8] sm:$0xff]   ;;  %v1976_v47 = vld [vmem:[%s2921_s4 + $0x5] ss:$0 sm:$0xff] }
 0x314   :  { %v763_v50 = vpop.f32.mrb[10].mxu0 }
 0x315   :  { %v766_v51 = vmax.f32 %v761_v48, 0.0  ;;  %v2238_v52 = vpop.f32.mrb[11].mxu0 }
 0x317   :  { %v786_v53 = vpack.c.bf16 %v766_v51, %v766_v51 }
 0x319   :  { %2256 = vmatmul.mubr.bf16.vlgmr.msra.gmra.mrb[8].mxu1 %v786_v53 }
 0x31a   :  { %2295 = vmatprep.mubr.msk.bf16.mxu1 %vm2678_vm0, %v2677_v35  ;;  %2280 = vmatpush3.bf16.msra.mxu1 %v2463_v56  ;;  %v2494_v56 = vld [vmem:[#allocation7 + $0x1f8] sm:$0xff]  }
 0x31b   :  { %2281 = vmatprep.subr.bf16.mxu1 %v2677_v35 }
 0x31e   :  { %2282 = vmatpush3.bf16.msra.mxu1 %v2464_v57  ;;  %v2495_v57 = vld [vmem:[#allocation8] ss:$20 sps:$4 sm:$0xff]  }
 0x31f   :  { %2283 = vmatprep.subr.bf16.mxu1 %v2677_v35 }
 0x322   :  { %2284 = vmatpush3.bf16.msra.mxu1 %v2465_v58  ;;  %v2497_v58 = vld [vmem:[#allocation8 + $0x4] ss:$20 sps:$4 sm:$0xff]  }
 0x323   :  { %2285 = vmatprep.subr.bf16.mxu1 %v2677_v35 }
 0x326   :  { %2286 = vmatpush3.bf16.msra.mxu1 %v2466_v59  ;;  %v2500_v59 = vld [vmem:[#allocation8 + $0xc] ss:$20 sps:$4 sm:$0xff]  }
 0x327   :  { %2287 = vmatprep.subr.bf16.mxu1 %v2677_v35 }
 0x32a   :  { %2288 = vmatpush3.bf16.msra.mxu1 %v2467_v60  ;;  %v2503_v60 = vld [vmem:[#allocation8 + $0x2c] ss:$20 sps:$4 sm:$0xff]  }
 0x32b   :  { %2289 = vmatprep.subr.bf16.mxu1 %v2677_v35 }
 0x32e   :  { %2290 = vmatpush3.bf16.msra.mxu1 %v2468_v61  ;;  %v2501_v61 = vld [vmem:[#allocation8 + $0x28] ss:$20 sps:$4 sm:$0xff]  }
 0x32f   :  { %2291 = vmatprep.subr.bf16.mxu1 %v2677_v35 }
 0x332   :  { %2292 = vmatpush3.bf16.msra.mxu1 %v2469_v6  ;;  %v2533_v6 = vld [vmem:[#allocation8 + $0xf4] ss:$20 sps:$4 sm:$0xff]  }
 0x333   :  { %2293 = vmatprep.subr.bf16.mxu1 %v2677_v35 }
 0x336   :  { %2294 = vmatpush3.bf16.msra.mxu1 %v2470_v7  ;;  %v2531_v7 = vld [vmem:[#allocation8 + $0xf0] ss:$20 sps:$4 sm:$0xff]  }
 0x337   :  { %2319 = vmatprep.subr.bf16.mxu1 %v2677_v35 }
 0x3ec   :  { %v875_v63 = vpop.f32.mrb[8].mxu1 }
 0x3ed   :  { %v876_v0 = vadd.f32 %v1946_v62, %v875_v63  ;;  %v2257_v1 = vpop.f32.mrb[9].mxu1  ;;  %v2509_v62 = vld [vmem:[#allocation8 + $0x54] ss:$20 sps:$4 sm:$0xff]   ;;  %v2507_v63 = vld [vmem:[#allocation8 + $0x50] ss:$20 sps:$4 sm:$0xff]  }
 0x3ee   :  { %v878_v2 = vpop.f32.mrb[10].mxu1  ;;  %v2513_v1 = vld [vmem:[#allocation8 + $0x78] ss:$20 sps:$4 sm:$0xff]  }
 0x3ef   :  { %v881_v3 = vmax.f32 %v876_v0, 0.0  ;;  %v2258_v4 = vpop.f32.mrb[11].mxu1  ;;  %v2515_v0 = vld [vmem:[#allocation8 + $0x7c] ss:$20 sps:$4 sm:$0xff]   ;;  %v2521_v2 = vld [vmem:[#allocation8 + $0xa4] ss:$20 sps:$4 sm:$0xff]  }
 0x3f0   :  { %v2527_v4 = vld [vmem:[#allocation8 + $0xcc] ss:$20 sps:$4 sm:$0xff]  }
 0x3f1   :  { %v901_v5 = vpack.c.bf16 %v881_v3, %v881_v3  ;;  %v2519_v3 = vld [vmem:[#allocation8 + $0xa0] ss:$20 sps:$4 sm:$0xff]  }
 0x3f3   :  { %2276 = vmatmul.mubr.bf16.vlgmr.msra.gmra.mrb[12].mxu0 %v901_v5  ;;  %v2525_v5 = vld [vmem:[#allocation8 + $0xc8] ss:$20 sps:$4 sm:$0xff]  }
 0x3f4   :  { %2315 = vmatprep.mubr.msk.bf16.mxu0 %vm2678_vm0, %v2677_v35  ;;  %2300 = vmatpush3.bf16.msra.mxu0 %v2471_v8  ;;  %v1986_v8 = vld [vmem:[%s2921_s4 + $0x6] ss:$0 sm:$0xff] }
 0x3f5   :  { %2301 = vmatprep.subr.bf16.mxu0 %v2677_v35 }
 0x3f8   :  { %2302 = vmatpush3.bf16.msra.mxu0 %v2472_v9 }
 0x3f9   :  { %2303 = vmatprep.subr.bf16.mxu0 %v2677_v35 }
 0x3fc   :  { %2304 = vmatpush3.bf16.msra.mxu0 %v2473_v10 }
 0x3fd   :  { %2305 = vmatprep.subr.bf16.mxu0 %v2677_v35 }
 0x400   :  { %2306 = vmatpush3.bf16.msra.mxu0 %v2474_v11 }
 0x401   :  { %2307 = vmatprep.subr.bf16.mxu0 %v2677_v35 }
 0x404   :  { %2308 = vmatpush3.bf16.msra.mxu0 %v2475_v12 }
 0x405   :  { %2309 = vmatprep.subr.bf16.mxu0 %v2677_v35 }
 0x408   :  { %2310 = vmatpush3.bf16.msra.mxu0 %v2476_v13 }
 0x409   :  { %2311 = vmatprep.subr.bf16.mxu0 %v2677_v35 }
 0x40c   :  { %2312 = vmatpush3.bf16.msra.mxu0 %v2477_v22  ;;  %v2516_v22 = vld [vmem:[#allocation8 + $0x80] ss:$20 sps:$4 sm:$0xff]  }
 0x40d   :  { %2313 = vmatprep.subr.bf16.mxu0 %v2677_v35 }
 0x410   :  { %2314 = vmatpush3.bf16.msra.mxu0 %v2478_v23  ;;  %v2524_v23 = vld [vmem:[#allocation8 + $0xac] ss:$20 sps:$4 sm:$0xff]  }
 0x411   :  { %2339 = vmatprep.subr.bf16.mxu0 %v2677_v35 }
 0x4c6   :  { %v990_v15 = vpop.f32.mrb[12].mxu0 }
 0x4c7   :  { %v991_v16 = vadd.f32 %v1956_v14, %v990_v15  ;;  %v2277_v17 = vpop.f32.mrb[13].mxu0  ;;  %v2498_v15 = vld [vmem:[#allocation8 + $0x8] ss:$20 sps:$4 sm:$0xff]  }
 0x4c8   :  { %v993_v18 = vpop.f32.mrb[14].mxu0  ;;  %v2506_v17 = vld [vmem:[#allocation8 + $0x34] ss:$20 sps:$4 sm:$0xff]  }
 0x4c9   :  { %v996_v19 = vmax.f32 %v991_v16, 0.0  ;;  %v2278_v20 = vpop.f32.mrb[15].mxu0  ;;  %v2504_v18 = vld [vmem:[#allocation8 + $0x30] ss:$20 sps:$4 sm:$0xff]  }
 0x4ca   :  { %v2510_v20 = vld [vmem:[#allocation8 + $0x58] ss:$20 sps:$4 sm:$0xff]  }
 0x4cb   :  { %v1016_v21 = vpack.c.bf16 %v996_v19, %v996_v19  ;;  %v2512_v19 = vld [vmem:[#allocation8 + $0x5c] ss:$20 sps:$4 sm:$0xff]  }
 0x4cd   :  { %2296 = vmatmul.mubr.bf16.vlgmr.msra.gmra.mrb[12].mxu1 %v1016_v21  ;;  %v2518_v21 = vld [vmem:[#allocation8 + $0x84] ss:$20 sps:$4 sm:$0xff]  }
 0x4ce   :  { %2335 = vmatprep.mubr.msk.bf16.mxu1 %vm2678_vm0, %v2677_v35  ;;  %2320 = vmatpush3.bf16.msra.mxu1 %v2479_v24  ;;  %v2522_v24 = vld [vmem:[#allocation8 + $0xa8] ss:$20 sps:$4 sm:$0xff]  }
 0x4cf   :  { %2321 = vmatprep.subr.bf16.mxu1 %v2677_v35 }
 0x4d2   :  { %2322 = vmatpush3.bf16.msra.mxu1 %v2480_v25  ;;  %v2530_v25 = vld [vmem:[#allocation8 + $0xd4] ss:$20 sps:$4 sm:$0xff]  }
 0x4d3   :  { %2323 = vmatprep.subr.bf16.mxu1 %v2677_v35 }
 0x4d6   :  { %2324 = vmatpush3.bf16.msra.mxu1 %v2481_v26  ;;  %v2528_v26 = vld [vmem:[#allocation8 + $0xd0] ss:$20 sps:$4 sm:$0xff]  }
 0x4d7   :  { %2325 = vmatprep.subr.bf16.mxu1 %v2677_v35 }
 0x4da   :  { %2326 = vmatpush3.bf16.msra.mxu1 %v2482_v27  ;;  %v2536_v27 = vld [vmem:[#allocation8 + $0xfc] ss:$20 sps:$4 sm:$0xff]  }
 0x4db   :  { %2327 = vmatprep.subr.bf16.mxu1 %v2677_v35 }
 0x4de   :  { %2328 = vmatpush3.bf16.msra.mxu1 %v2483_v28  ;;  %v2534_v28 = vld [vmem:[#allocation8 + $0xf8] ss:$20 sps:$4 sm:$0xff]  }
 0x4df   :  { %2329 = vmatprep.subr.bf16.mxu1 %v2677_v35 }
 0x4e2   :  { %2330 = vmatpush3.bf16.msra.mxu1 %v2484_v29  ;;  %v2539_v29 = vld [vmem:[#allocation8 + $0x11c] ss:$20 sps:$4 sm:$0xff]  }
 0x4e3   :  { %2331 = vmatprep.subr.bf16.mxu1 %v2677_v35 }
 0x4e6   :  { %2332 = vmatpush3.bf16.msra.mxu1 %v2485_v39 }
 0x4e7   :  { %2333 = vmatprep.subr.bf16.mxu1 %v2677_v35 }
 0x4ea   :  { %2334 = vmatpush3.bf16.msra.mxu1 %v2486_v40 }
 0x4eb   :  { %1741 = vmatprep.subr.bf16.mxu1 %v2497_v58 }
 0x5a0   :  { %v1105_v31 = vpop.f32.mrb[12].mxu1 }
 0x5a1   :  { %v1106_v32 = vadd.f32 %v1966_v30, %v1105_v31  ;;  %v2297_v33 = vpop.f32.mrb[13].mxu1  ;;  %v2537_v30 = vld [vmem:[#allocation8 + $0x118] ss:$20 sps:$4 sm:$0xff]  }
 0x5a2   :  { %v1108_v34 = vpop.f32.mrb[14].mxu1  ;;  %v2542_v31 = vld [vmem:[#allocation8 + $0x124] ss:$20 sps:$4 sm:$0xff]   ;;  %v2679_v33 = vmov 0  }
 0x5a3   :  { %v1111_v36 = vmax.f32 %v1106_v32, 0.0  ;;  %v2298_v37 = vpop.f32.mrb[15].mxu1  ;;  %v2540_v32 = vld [vmem:[#allocation8 + $0x120] ss:$20 sps:$4 sm:$0xff]   ;;  %v1996_v34 = vld [vmem:[%s2921_s4 + $0x7] ss:$0 sm:$0xff] }
 0x5a5   :  { %v1131_v38 = vpack.c.bf16 %v1111_v36, %v1111_v36 }
 0x5a7   :  { %2316 = vmatmul.mubr.bf16.vlgmr.msra.gmra.mrb[16].mxu0 %v1131_v38 }
 0x5a8   :  { %2355 = vmatprep.mubr.msk.bf16.mxu0 %vm2678_vm0, %v2677_v35  ;;  %2340 = vmatpush3.bf16.msra.mxu0 %v2487_v41 }
 0x5a9   :  { %2341 = vmatprep.subr.bf16.mxu0 %v2677_v35 }
 0x5ac   :  { %2342 = vmatpush3.bf16.msra.mxu0 %v2488_v42  ;;  %v2543_v42 = vld [vmem:[#allocation8 + $0x10] ss:$20 sps:$4 sm:$0xff]  }
 0x5ad   :  { %2343 = vmatprep.subr.bf16.mxu0 %v2677_v35 }
 0x5b0   :  { %2344 = vmatpush3.bf16.msra.mxu0 %v2489_v43 }
 0x5b1   :  { %2345 = vmatprep.subr.bf16.mxu0 %v2677_v35 }
 0x5b4   :  { %2346 = vmatpush3.bf16.msra.mxu0 %v2490_v44  ;;  %v2544_v44 = vld [vmem:[#allocation8 + $0x38] ss:$20 sps:$4 sm:$0xff]  }
 0x5b5   :  { %2347 = vmatprep.subr.bf16.mxu0 %v2677_v35 }
 0x5b8   :  { %2348 = vmatpush3.bf16.msra.mxu0 %v2491_v45  ;;  %v2545_v45 = vld [vmem:[#allocation8 + $0x60] ss:$20 sps:$4 sm:$0xff]  }
 0x5b9   :  { %2349 = vmatprep.subr.bf16.mxu0 %v2677_v35 }
 0x5bc   :  { %2350 = vmatpush3.bf16.msra.mxu0 %v2492_v46  ;;  %v2546_v46 = vld [vmem:[#allocation8 + $0x88] ss:$20 sps:$4 sm:$0xff]  }
 0x5bd   :  { %2351 = vmatprep.subr.bf16.mxu0 %v2677_v35 }
 0x5c0   :  { %2352 = vmatpush3.bf16.msra.mxu0 %v2493_v55  ;;  %v1506_v55 = vld [vmem:[%s2923_s6] sm:$0x1f]  ;;  %s2680_s6 = smov [#allocation10]  }
 0x5c1   :  { %2353 = vmatprep.subr.bf16.mxu0 %v2677_v35  ;;  %s1874_s22 = sshll.u32 %s2680_s6, 4  ;;  %s1875_s22 = int_to_ptr.vmem [resolvable:$true] %s1874_s22 }
 0x5c2   :  { %s2639_s23 = scalar_lea.vmem %s1875_s22, 640  ;;  %p2644_p5 = scmp.lt.s32.totalorder %s1875_s22, %s1875_s22 }
 0x5c3   :  { %p2640_p4 = scmp.ne.s32.totalorder %s1875_s22, %s2639_s23  ;;  %p2645_p6 = scmp.lt.s32.totalorder %s2639_s23, %s2639_s23 }
 0x5c4   :  { %2354 = vmatpush3.bf16.msra.mxu0 %v2494_v56 }
 0x5c5   :  { %1782 = vmatprep.subr.bf16.mxu0 %v2500_v59  ;;  %p2646_p7 = por %p2645_p6, %p2644_p5 }
 0x5c7   :  { %p2647_p8 = pnand %p2646_p7, %p2640_p4 }
 0x67a   :  { %v1220_v48 = vpop.f32.mrb[16].mxu0 }
 0x67b   :  { %v1221_v49 = vadd.f32 %v1976_v47, %v1220_v48  ;;  %v2317_v50 = vpop.f32.mrb[17].mxu0  ;;  %v2547_v47 = vld [vmem:[#allocation8 + $0xb0] ss:$20 sps:$4 sm:$0xff]   ;;  %v2548_v48 = vld [vmem:[#allocation8 + $0xd8] ss:$20 sps:$4 sm:$0xff]  }
 0x67c   :  { %v1223_v51 = vpop.f32.mrb[18].mxu0  ;;  %v2550_v50 = vld [vmem:[#allocation8 + $0x128] ss:$20 sps:$4 sm:$0xff]  }
 0x67d   :  { %v1226_v52 = vmax.f32 %v1221_v49, 0.0  ;;  %v2318_v53 = vpop.f32.mrb[19].mxu0  ;;  %v2549_v49 = vld [vmem:[#allocation8 + $0x100] ss:$20 sps:$4 sm:$0xff]   ;;  %v1508_v51 = vlaneseq }
 0x67f   :  { %v1246_v54 = vpack.c.bf16 %v1226_v52, %v1226_v52  ;;  %v1509_v52 = vshrl.u32 %v1508_v51, 7 }
 0x681   :  { %2336 = vmatmul.mubr.bf16.vlgmr.msra.gmra.mrb[16].mxu1 %v1246_v54  ;;  %v1510_v53 = vsub.s32 0, %v1509_v52  ;;  %v1518_v54 = vsub.s32 2, %v1509_v52  ;;  %v1514_v56 = vsub.s32 1, %v1509_v52 }
 0x682   :  { %1742 = vmatpush1.bf16.msra.mxu1 %v2495_v57  ;;  %1773 = vmatprep.mubr.bf16.mxu1 %v2679_v33  ;;  %v1522_v57 = vsub.s32 3, %v1509_v52 }
 0x683   :  { %1743 = vmatprep.subr.bf16.mxu1 %v2503_v60  ;;  %v1511_v58 = vrot.slane %v1506_v55, %v1510_v53  ;;  %v1519_v59 = vrot.slane %v1506_v55, %v1518_v54  ;;  %v1515_v60 = vrot.slane %v1506_v55, %v1514_v56 }
 0x686   :  { %1744 = vmatpush1.bf16.msra.mxu1 %v2501_v61  ;;  %v1523_v61 = vrot.slane %v1506_v55, %v1522_v57 }
 0x687   :  { %1745 = vmatprep.subr.bf16.mxu1 %v2509_v62 }
 0x68a   :  { %1746 = vmatpush1.bf16.msra.mxu1 %v2507_v63 }
 0x68b   :  { %1747 = vmatprep.subr.bf16.mxu1 %v2515_v0 }
 0x68e   :  { %1748 = vmatpush1.bf16.msra.mxu1 %v2513_v1 }
 0x68f   :  { %1749 = vmatprep.subr.bf16.mxu1 %v2521_v2 }
 0x692   :  { %1750 = vmatpush1.bf16.msra.mxu1 %v2519_v3 }
 0x693   :  { %1751 = vmatprep.subr.bf16.mxu1 %v2527_v4 }
 0x696   :  { %1752 = vmatpush1.bf16.msra.mxu1 %v2525_v5 }
 0x697   :  { %1753 = vmatprep.subr.bf16.mxu1 %v2533_v6 }
 0x69a   :  { %1754 = vmatpush1.bf16.msra.mxu1 %v2531_v7 }
 0x69b   :  { %1755 = vmatprep.subr.bf16.mxu1 %v2539_v29 }
 0x69e   :  { %1756 = vmatpush1.bf16.msra.mxu1 %v2537_v30 }
 0x69f   :  { %2359 = vmatprep.subr.bf16.mxu1 %v2677_v35 }
 0x754   :  { %v1335_v9 = vpop.f32.mrb[16].mxu1 }
 0x755   :  { %v1336_v10 = vadd.f32 %v1986_v8, %v1335_v9  ;;  %v2337_v11 = vpop.f32.mrb[17].mxu1  ;;  %v1526_v9 = vsub.s32 4, %v1509_v52 }
 0x756   :  { %v1338_v12 = vpop.f32.mrb[18].mxu1 }
 0x757   :  { %v1341_v13 = vmax.f32 %v1336_v10, 0.0  ;;  %v2338_v14 = vpop.f32.mrb[19].mxu1  ;;  %v1527_v10 = vrot.slane %v1506_v55, %v1526_v9 }
 0x759   :  { %v1361_v16 = vpack.c.bf16 %v1341_v13, %v1341_v13 }
 0x75b   :  { %2356 = vmatmul.mubr.bf16.vlgmr.msra.gmra.mrb[20].mxu0 %v1361_v16 }
 0x75c   :  { %1783 = vmatpush1.bf16.msra.mxu0 %v2498_v15  ;;  %1814 = vmatprep.mubr.bf16.mxu0 %v2679_v33 }
 0x75d   :  { %1784 = vmatprep.subr.bf16.mxu0 %v2506_v17 }
 0x760   :  { %1785 = vmatpush1.bf16.msra.mxu0 %v2504_v18 }
 0x761   :  { %1786 = vmatprep.subr.bf16.mxu0 %v2512_v19 }
 0x764   :  { %1787 = vmatpush1.bf16.msra.mxu0 %v2510_v20 }
 0x765   :  { %1788 = vmatprep.subr.bf16.mxu0 %v2518_v21 }
 0x768   :  { %1789 = vmatpush1.bf16.msra.mxu0 %v2516_v22 }
 0x769   :  { %1790 = vmatprep.subr.bf16.mxu0 %v2524_v23 }
 0x76c   :  { %1791 = vmatpush1.bf16.msra.mxu0 %v2522_v24 }
 0x76d   :  { %1792 = vmatprep.subr.bf16.mxu0 %v2530_v25 }
 0x770   :  { %1793 = vmatpush1.bf16.msra.mxu0 %v2528_v26 }
 0x771   :  { %1794 = vmatprep.subr.bf16.mxu0 %v2536_v27 }
 0x774   :  { %1795 = vmatpush1.bf16.msra.mxu0 %v2534_v28 }
 0x775   :  { %1796 = vmatprep.subr.bf16.mxu0 %v2542_v31 }
 0x778   :  { %1797 = vmatpush1.bf16.msra.mxu0 %v2540_v32 }
 0x82e   :  { %v1450_v36 = vpop.f32.mrb[20].mxu0 }
 0x82f   :  { %v1451_v37 = vadd.f32 %v1996_v34, %v1450_v36  ;;  %v2357_v38 = vpop.f32.mrb[21].mxu0 }
 0x830   :  { %v1453_v39 = vpop.f32.mrb[22].mxu0 }
 0x831   :  { %v1456_v40 = vmax.f32 %v1451_v37, 0.0  ;;  %v2358_v41 = vpop.f32.mrb[23].mxu0 }
 0x833   :  { %v1457_v43 = vpack.c.bf16 %v1456_v40, %v1456_v40 }
 0x835   :  { %1774 = vmatmul.mubr.bf16.vlgmr.msra.gmra.mrb[20].mxu1 %v1457_v43  ;;  %1815 = vmatmul.mubr.bf16.vlgmr.msra.gmra.mrb[24].mxu0 %v1457_v43 }
 0x836   :  { %2360 = vmatpush3.bf16.msra.mxu1 %v2543_v42  ;;  %2375 = vmatprep.mubr.msk.bf16.mxu1 %vm2678_vm0, %v2677_v35 }
 0x837   :  { %2361 = vmatprep.subr.bf16.mxu1 %v2677_v35 }
 0x83a   :  { %2362 = vmatpush3.bf16.msra.mxu1 %v2544_v44 }
 0x83b   :  { %2363 = vmatprep.subr.bf16.mxu1 %v2677_v35 }
 0x83e   :  { %2364 = vmatpush3.bf16.msra.mxu1 %v2545_v45 }
 0x83f   :  { %2365 = vmatprep.subr.bf16.mxu1 %v2677_v35 }
 0x842   :  { %2366 = vmatpush3.bf16.msra.mxu1 %v2546_v46 }
 0x843   :  { %2367 = vmatprep.subr.bf16.mxu1 %v2677_v35 }
 0x846   :  { %2368 = vmatpush3.bf16.msra.mxu1 %v2547_v47 }
 0x847   :  { %2369 = vmatprep.subr.bf16.mxu1 %v2677_v35 }
 0x84a   :  { %2370 = vmatpush3.bf16.msra.mxu1 %v2548_v48 }
 0x84b   :  { %2371 = vmatprep.subr.bf16.mxu1 %v2677_v35 }
 0x84e   :  { %2372 = vmatpush3.bf16.msra.mxu1 %v2549_v49 }
 0x84f   :  { %2373 = vmatprep.subr.bf16.mxu1 %v2677_v35 }
 0x852   :  { %2374 = vmatpush3.bf16.msra.mxu1 %v2550_v50 }
 0x855   :  { %2376 = vmatmul.mubr.bf16.vlgmr.msra.gmra.mrb[24].mxu1 %v1457_v43 }
 0x908   :  { %v1775_v62 = vpop.f32.mrb[20].mxu1  ;;  %v1816_v63 = vpop.f32.mrb[24].mxu0 }
 0x909   :  { %v1776_v0 = vadd.f32 %v1775_v62, %v1511_v58  ;;  %v1817_v35 = vadd.f32 %v1816_v63, %v1519_v59  ;;  %v1777_v1 = vpop.f32.mrb[21].mxu1  ;;  %v1818_v2 = vpop.f32.mrb[25].mxu0 }
 0x90a   :  { %v1778_v3 = vadd.f32 %v1777_v1, %v1515_v60  ;;  %v1819_v4 = vadd.f32 %v1818_v2, %v1523_v61  ;;  %v1779_v5 = vpop.f32.mrb[22].mxu1  ;;  %v1820_v6 = vpop.f32.mrb[26].mxu0 }
 0x90b   :  { %1863 = vst [vmem:[#allocation10] sm:$0xff] %v1776_v0  ;;  %1865 = vst [vmem:[#allocation10 + $0x10] sm:$0xff] %v1817_v35  ;;  %v1780_v7 = vpop.f32.mrb[23].mxu1  ;;  %v1821_v8 = vpop.f32.mrb[27].mxu0 }
 0x90c   :  { %1864 = vst [vmem:[#allocation10 + $0x8] sm:$0xff] %v1778_v3  ;;  %1866 = vst [vmem:[#allocation10 + $0x18] sm:$0xff] %v1819_v4 }
 0x928   :  { %v1857_v11 = vpop.f32.mrb[24].mxu1 }
 0x929   :  { %v1858_v12 = vadd.f32 %v1857_v11, %v1527_v10  ;;  %v2377_v13 = vpop.f32.mrb[25].mxu1 }
 0x92a   :  { %v1860_v14 = vpop.f32.mrb[26].mxu1 }
 0x92b   :  { %1867 = vst [vmem:[#allocation10 + $0x20] sm:$0xff] %v1858_v12  ;;  %v2378_v15 = vpop.f32.mrb[27].mxu1 }
 0x92c   :  { %2650 = shalt.err (!%p2647_p8)
}
 0x92d   :  { %s2651_s1 = scalar_lea.hbm %s2924_s7, 640 }
 0x92e   :  { %p2652_p9 = scmp.ne.s32.totalorder %s2924_s7, %s2651_s1  ;;  %p2655_p10 = scmp.lt.u32.totalorder %s2651_s1, %s2924_s7 }
 0x930   :  { %p2657_p11 = pnand %p2655_p10, %p2652_p9 }
 0x932   :  { %2660 = shalt.err (!%p2657_p11)
}
 0x933   :  { %1877 = dma.vmem_to_hbm [thread:$0]  %s1875_s22, 640, %s2924_s7, [#allocation4]  }
 0x934   :  { %2667 = dma.done.wait [#allocation4], 640  }
 0x935   :  { %2668 = vsyncadd [#allocation4], 4294966656 }
 0x936   :  { %1881 = vsyncpa [#allocation3], 1 }
 0x937   :  { %1882 = vsyncpa [#allocation6], 1 }
 0x938   :  { %1883 = vsyncpa [#allocation9], 1 }
 0x939   :  { %1884 = vsyncpa [#allocation4], 1 }

</bundles_post_ra>
